<compile_context>
chip_gen: v5e
topology: v5e:2x2
jax: 0.10.0
libtpu: 0.0.40
codegen_flags: <defaults>
</compile_context>

<pallas_src>
import jax
import jax.numpy as jnp
from jax.experimental import pallas as pl
from jax.experimental.pallas import tpu as pltpu


def _onepl_kernel(theta_ref, b_ref, out_ref):
    logits = theta_ref[...].astype(jnp.float32) - b_ref[...].astype(jnp.float32)
    # sigmoid(x) = 0.5 * (tanh(x / 2) + 1): EUP-only transcendental, no VPU
    # divide chain.  Differs from an exp/div sigmoid only at the few-ulp level.
    p = 0.5 * (jnp.tanh(0.5 * logits) + 1.0)
    out_ref[...] = p.astype(out_ref.dtype)


def _round_up(x, m):
    return ((x + m - 1) // m) * m


def _sublane_granule(dtype):
    # Minimum sublane tile: 8 for 32-bit, 16 for 16-bit, 32 for 8-bit dtypes.
    bits = jnp.dtype(dtype).itemsize * 8
    return max(8, 256 // bits)


def _num_tensorcores():
    """Best-effort TC-per-chip probe; defaults to 1 (no forced split)."""
    try:
        info = pltpu.get_tpu_info()
    except Exception:
        return 1
    for name in ("tensorcores_per_chip", "num_tensorcores", "num_cores",
                 "cores_per_chip", "core_count"):
        v = getattr(info, name, None)
        if isinstance(v, int) and v > 0:
            return v
    return 1


def _pick_tiles(n_persons, n_items, dtype):
    """Lane-dense blocks targeting ~8 MiB; full item width when it fits."""
    itemsize = jnp.dtype(dtype).itemsize
    sub = _sublane_granule(dtype)
    target_block_bytes = 8 * 1024 * 1024
    lane_cap = 4096  # full-width blocks up to 4096 lanes keep >=512 f32 rows/block

    full_n = _round_up(n_items, 128)
    tile_n = full_n if full_n <= lane_cap else lane_cap

    max_tile_m = max(sub, (target_block_bytes // (tile_n * itemsize)) // sub * sub)
    tile_m = min(max_tile_m, _round_up(n_persons, sub))
    tile_m = max(sub, (tile_m // sub) * sub)

    grid_m = pl.cdiv(n_persons, tile_m)
    grid_n = pl.cdiv(n_items, tile_n)

    # Only split rows 2-way when the whole problem would otherwise be a single
    # block AND the chip actually has >=2 TensorCores (v7x megacore).
    if grid_m * grid_n == 1 and n_persons >= 2 * sub and _num_tensorcores() >= 2:
        tile_m = max(sub, _round_up(-(-n_persons // 2), sub))
        grid_m = pl.cdiv(n_persons, tile_m)

    return tile_m, tile_n, grid_m, grid_n


def onepl_forward(theta, b):
    """p_ij = sigmoid(theta_i - b_j), matching OnePLModel.forward."""
    n_persons, n_items = theta.shape
    itemsize = jnp.dtype(theta.dtype).itemsize
    tile_m, tile_n, grid_m, grid_n = _pick_tiles(n_persons, n_items, theta.dtype)

    b2d = b.reshape(1, n_items)

    if grid_n == 1:
        # Full-width row blocks: contiguous theta/out DMAs, b stays resident.
        grid = (grid_m,)
        theta_spec = pl.BlockSpec((tile_m, tile_n), lambda i: (i, 0))
        b_spec = pl.BlockSpec((1, tile_n), lambda i: (0, 0))
        out_spec = pl.BlockSpec((tile_m, tile_n), lambda i: (i, 0))
        dims = ("parallel",)
    else:
        # Item axis outer so the (1, tile_n) b block only changes on outer steps.
        grid = (grid_n, grid_m)
        theta_spec = pl.BlockSpec((tile_m, tile_n), lambda j, i: (i, j))
        b_spec = pl.BlockSpec((1, tile_n), lambda j, i: (0, j))
        out_spec = pl.BlockSpec((tile_m, tile_n), lambda j, i: (i, j))
        dims = ("parallel", "parallel")

    cost = pl.CostEstimate(
        flops=n_persons * n_items,             # broadcast subtract
        transcendentals=n_persons * n_items,   # one tanh per element
        bytes_accessed=(2 * n_persons * n_items + n_items) * itemsize,
    )

    return pl.pallas_call(
        _onepl_kernel,
        out_shape=jax.ShapeDtypeStruct((n_persons, n_items), theta.dtype),
        grid_spec=pltpu.PrefetchScalarGridSpec(
            num_scalar_prefetch=0,
            grid=grid,
            in_specs=[theta_spec, b_spec],
            out_specs=out_spec,
        ),
        compiler_params=pltpu.CompilerParams(
            dimension_semantics=dims,
            # Double-buffered 8 MiB in + 8 MiB out blocks = 32 MiB (+ tiny b);
            # 48 MiB leaves headroom under v7x's 64 MiB physical VMEM.
            vmem_limit_bytes=48 * 1024 * 1024,
        ),
        cost_estimate=cost,
    )(theta, b2d)
    # TODO(synk): for tiny inputs or when fused into compute_loss, prefer the
    # plain jnp expression so XLA fuses it and skips a standalone HBM round-trip.


if __name__ == "__main__":
    # Deliberately ragged small shapes (not multiples of 8/128) to exercise the
    # pl.cdiv grid with padded edge reads and masked edge writes.
    n_persons, n_items = 300, 200

    key = jax.random.PRNGKey(0)
    k_theta, k_b = jax.random.split(key)
    theta = jax.random.normal(k_theta, (n_persons, n_items), dtype=jnp.float32)
    # Module inits b to zeros; use a deterministic nonzero b so the broadcast
    # path is actually exercised by the correctness check.
    b = 0.1 * jax.random.normal(k_b, (n_items,), dtype=jnp.float32)

    out = onepl_forward(theta, b)
    out = jax.block_until_ready(out)

    # Reference = plain-JAX version of the PyTorch forward.
    ref = jax.nn.sigmoid(theta - b[None, :])
    assert out.shape == (n_persons, n_items)
    # tanh-form sigmoid (EUP) vs XLA's logistic differ by a few ulps at most.
    assert jnp.allclose(out, ref, atol=1e-5, rtol=1e-5), "mismatch vs reference"

    print("KERNEL_OK")
</pallas_src>

<mosaic_0001>
module attributes {stable_mosaic.version = 11 : i64} {
  func.func @_onepl_kernel(%arg0: i32, %arg1: memref<304x256xf32, #tpu.memory_space<vmem>>, %arg2: memref<1x256xf32, #tpu.memory_space<vmem>>, %arg3: memref<304x256xf32, #tpu.memory_space<vmem>>) attributes {dimension_semantics = [#tpu.dimension_semantics<parallel>], iteration_bounds = array<i64: 1>, scalar_prefetch = 0 : i64, scratch_operands = 0 : i64, tpu.core_type = #tpu.core_type<tc>, window_params = [{transform_indices = @transform_0, window_bounds = array<i64: 304, 256>}, {transform_indices = @transform_1, window_bounds = array<i64: 1, 256>}, {transform_indices = @transform_2, window_bounds = array<i64: 304, 256>}]} {
    %c0 = arith.constant 0 : index
    %c0_0 = arith.constant 0 : index
    %0 = vector.load %arg1[%c0, %c0_0] : memref<304x256xf32, #tpu.memory_space<vmem>>, vector<304x256xf32>
    %c0_1 = arith.constant 0 : index
    %c0_2 = arith.constant 0 : index
    %1 = vector.load %arg2[%c0_1, %c0_2] : memref<1x256xf32, #tpu.memory_space<vmem>>, vector<1x256xf32>
    %2 = vector.broadcast %1 : vector<1x256xf32> to vector<304x256xf32>
    %3 = arith.subf %0, %2 : vector<304x256xf32>
    %cst = arith.constant 5.000000e-01 : f32
    %4 = vector.broadcast %cst : f32 to vector<304x256xf32>
    %5 = arith.mulf %4, %3 : vector<304x256xf32>
    %6 = math.tanh %5 : vector<304x256xf32>
    %cst_3 = arith.constant 1.000000e+00 : f32
    %7 = vector.broadcast %cst_3 : f32 to vector<304x256xf32>
    %8 = arith.addf %6, %7 : vector<304x256xf32>
    %cst_4 = arith.constant 5.000000e-01 : f32
    %9 = vector.broadcast %cst_4 : f32 to vector<304x256xf32>
    %10 = arith.mulf %9, %8 : vector<304x256xf32>
    %c0_5 = arith.constant 0 : index
    %c0_6 = arith.constant 0 : index
    %11 = vector.load %arg3[%c0_5, %c0_6] : memref<304x256xf32, #tpu.memory_space<vmem>>, vector<304x256xf32>
    tpu.vector_store %arg3[%c0_5, %c0_6], %10 {strides = array<i32>} : memref<304x256xf32, #tpu.memory_space<vmem>>, vector<304x256xf32>,
    return
  }
  func.func @transform_0(%arg0: i32) -> (i32, i32) {
    %c0_i32 = arith.constant 0 : i32
    %c0_i32_0 = arith.constant 0 : i32
    return %arg0, %c0_i32 : i32, i32
  }
  func.func @transform_1(%arg0: i32) -> (i32, i32) {
    %c0_i32 = arith.constant 0 : i32
    %c0_i32_0 = arith.constant 0 : i32
    %c0_i32_1 = arith.constant 0 : i32
    return %c0_i32, %c0_i32_0 : i32, i32
  }
  func.func @transform_2(%arg0: i32) -> (i32, i32) {
    %c0_i32 = arith.constant 0 : i32
    %c0_i32_0 = arith.constant 0 : i32
    return %arg0, %c0_i32 : i32, i32
  }
}

</mosaic_0001>

<bundles_post_ra>
// kernel: tpu_custom_call.1
= control target key start
LH: loop header
LB: loop body
LE: loop exit
PB: predicated region body
PF: predicated region fallthrough
CT: control target
= control target key end

     0   :  { %s1268_s0 = inlined_call_operand.vmem [shape: f32[300,200], index: 0, kind: input, shape index: {}]   ;;  %s1269_s1 = inlined_call_operand.vmem [shape: f32[1,200], index: 1, kind: input, shape index: {}]   ;;  %s1270_s2 = inlined_call_operand.vmem [shape: f32[300,200], index: 2, kind: output, shape index: {}]  }
   0x1   :  { %v11_v0 = vld [vmem:[%s1268_s0] sm:$0xff]  ;;  %v12_v2 = vld [vmem:[%s1268_s0 + $0x8] sm:$0xff]  ;;  %v13_v5 = vld [vmem:[%s1268_s0 + $0x10] sm:$0xff] }
   0x2   :  { %v87_v1 = vld [vmem:[%s1269_s1] sm:$0x3]  ;;  %v14_v6 = vld [vmem:[%s1268_s0 + $0x18] sm:$0xff]  ;;  %v16_v8 = vld [vmem:[%s1268_s0 + $0x28] sm:$0xff] }
   0x3   :  { %v729_v3 = vperm.slane %v87_v1, 0  ;;  %v731_v4 = vperm.slane %v87_v1, 1  ;;  %v15_v7 = vld [vmem:[%s1268_s0 + $0x20] sm:$0xff]  ;;  %v17_v9 = vld [vmem:[%s1268_s0 + $0x30] sm:$0xff]  ;;  %v18_v10 = vld [vmem:[%s1268_s0 + $0x38] sm:$0xff] }
   0x4   :  { %v19_v15 = vld [vmem:[%s1268_s0 + $0x40] sm:$0xff]  ;;  %v20_v20 = vld [vmem:[%s1268_s0 + $0x48] sm:$0xff]  ;;  %v21_v21 = vld [vmem:[%s1268_s0 + $0x50] sm:$0xff] }
   0x5   :  { %v93_v11 = vsub.f32 %v11_v0, %v729_v3  ;;  %v94_v12 = vsub.f32 %v12_v2, %v731_v4  ;;  %v95_v13 = vsub.f32 %v13_v5, %v729_v3  ;;  %v96_v14 = vsub.f32 %v14_v6, %v731_v4  ;;  %v22_v22 = vld [vmem:[%s1268_s0 + $0x58] sm:$0xff]  ;;  %v23_v27 = vld [vmem:[%s1268_s0 + $0x60] sm:$0xff]  ;;  %v24_v28 = vld [vmem:[%s1268_s0 + $0x68] sm:$0xff] }
   0x6   :  { %v97_v16 = vsub.f32 %v15_v7, %v729_v3  ;;  %v98_v17 = vsub.f32 %v16_v8, %v731_v4  ;;  %v99_v18 = vsub.f32 %v17_v9, %v729_v3  ;;  %v100_v19 = vsub.f32 %v18_v10, %v731_v4  ;;  %v25_v39 = vld [vmem:[%s1268_s0 + $0x70] sm:$0xff]  ;;  %v26_v40 = vld [vmem:[%s1268_s0 + $0x78] sm:$0xff]  ;;  %v27_v41 = vld [vmem:[%s1268_s0 + $0x80] sm:$0xff] }
   0x7   :  { %v169_v23 = vmul.f32 0.5, %v93_v11  ;;  %v170_v24 = vmul.f32 0.5, %v94_v12  ;;  %v171_v25 = vmul.f32 0.5, %v95_v13  ;;  %v172_v26 = vmul.f32 0.5, %v96_v14  ;;  %v28_v45 = vld [vmem:[%s1268_s0 + $0x88] sm:$0xff]  ;;  %v29_v46 = vld [vmem:[%s1268_s0 + $0x90] sm:$0xff] }
   0x8   :  { %v173_v29 = vmul.f32 0.5, %v97_v16  ;;  %v174_v30 = vmul.f32 0.5, %v98_v17  ;;  %v175_v31 = vmul.f32 0.5, %v99_v18  ;;  %v176_v32 = vmul.f32 0.5, %v100_v19  ;;  %v30_v47 = vld [vmem:[%s1268_s0 + $0x98] sm:$0xff]  ;;  %v31_v57 = vld [vmem:[%s1268_s0 + $0xa0] sm:$0xff] }
   0x9   :  { %553 = vtanh.f32 %v169_v23  ;;  %v101_v33 = vsub.f32 %v19_v15, %v729_v3  ;;  %v102_v34 = vsub.f32 %v20_v20, %v731_v4  ;;  %v103_v35 = vsub.f32 %v21_v21, %v729_v3  ;;  %v32_v62 = vld [vmem:[%s1268_s0 + $0xa8] sm:$0xff]  ;;  %v33_v13 = vld [vmem:[%s1268_s0 + $0xb0] sm:$0xff]  ;;  %v34_v18 = vld [vmem:[%s1268_s0 + $0xb8] sm:$0xff] }
   0xa   :  { %555 = vtanh.f32 %v170_v24  ;;  %v104_v36 = vsub.f32 %v22_v22, %v731_v4  ;;  %v105_v37 = vsub.f32 %v23_v27, %v729_v3  ;;  %v106_v38 = vsub.f32 %v24_v28, %v731_v4 }
   0xb   :  { %557 = vtanh.f32 %v171_v25  ;;  %v177_v42 = vmul.f32 0.5, %v101_v33  ;;  %v178_v43 = vmul.f32 0.5, %v102_v34  ;;  %v179_v44 = vmul.f32 0.5, %v103_v35 }
   0xc   :  { %559 = vtanh.f32 %v172_v26  ;;  %v180_v48 = vmul.f32 0.5, %v104_v36  ;;  %v181_v49 = vmul.f32 0.5, %v105_v37  ;;  %v182_v50 = vmul.f32 0.5, %v106_v38  ;;  %v36_v36 = vld [vmem:[%s1268_s0 + $0xc8] sm:$0xff] }
   0xd   :  { %561 = vtanh.f32 %v173_v29  ;;  %v107_v51 = vsub.f32 %v25_v39, %v729_v3  ;;  %v108_v52 = vsub.f32 %v26_v40, %v731_v4  ;;  %v109_v53 = vsub.f32 %v27_v41, %v729_v3 }
   0xe   :  { %563 = vtanh.f32 %v174_v30  ;;  %v110_v54 = vsub.f32 %v28_v45, %v731_v4  ;;  %v111_v55 = vsub.f32 %v29_v46, %v729_v3  ;;  %v112_v56 = vsub.f32 %v30_v47, %v731_v4 }
   0xf   :  { %v554_v58 = vpop.eup %553  ;;  %565 = vtanh.f32 %v175_v31  ;;  %v183_v59 = vmul.f32 0.5, %v107_v51  ;;  %v184_v60 = vmul.f32 0.5, %v108_v52  ;;  %v185_v61 = vmul.f32 0.5, %v109_v53  ;;  %v35_v31 = vld [vmem:[%s1268_s0 + $0xc0] sm:$0xff] }
  0x10   :  { %v556_v63 = vpop.eup %555  ;;  %v321_v0 = vadd.f32 1.0, %v554_v58  ;;  %567 = vtanh.f32 %v176_v32  ;;  %v186_v1 = vmul.f32 0.5, %v110_v54  ;;  %v813_v2 = vmul.f32 0.5, %v111_v55  ;;  %v38_v54 = vld [vmem:[%s1268_s0 + $0xd8] sm:$0xff] }
  0x11   :  { %v558_v5 = vpop.eup %557  ;;  %v322_v6 = vadd.f32 1.0, %v556_v63  ;;  %569 = vtanh.f32 %v177_v42  ;;  %v815_v7 = vmul.f32 0.5, %v112_v56  ;;  %v113_v8 = vsub.f32 %v31_v57, %v729_v3 }
  0x12   :  { %v560_v9 = vpop.eup %559  ;;  %v397_v10 = vmul.f32 0.5, %v321_v0  ;;  %v323_v11 = vadd.f32 1.0, %v558_v5  ;;  %571 = vtanh.f32 %v178_v43  ;;  %v114_v12 = vsub.f32 %v32_v62, %v731_v4  ;;  %v39_v5 = vld [vmem:[%s1268_s0 + $0xe0] sm:$0xff] }
  0x13   :  { %v562_v14 = vpop.eup %561  ;;  %v398_v15 = vmul.f32 0.5, %v322_v6  ;;  %v324_v16 = vadd.f32 1.0, %v560_v9  ;;  %573 = vtanh.f32 %v179_v44  ;;  %v822_v17 = vmul.f32 0.5, %v113_v8 }
  0x14   :  { %v564_v19 = vpop.eup %563  ;;  %473 = vst [vmem:[%s1270_s2] sm:$0xff] %v397_v10  ;;  %v399_v20 = vmul.f32 0.5, %v323_v11  ;;  %v325_v21 = vadd.f32 1.0, %v562_v14  ;;  %575 = vtanh.f32 %v180_v48  ;;  %v190_v22 = vmul.f32 0.5, %v114_v12  ;;  %v40_v10 = vld [vmem:[%s1268_s0 + $0xe8] sm:$0xff] }
  0x15   :  { %v566_v23 = vpop.eup %565  ;;  %474 = vst [vmem:[%s1270_s2 + $0x8] sm:$0xff] %v398_v15  ;;  %v400_v24 = vmul.f32 0.5, %v324_v16  ;;  %v326_v25 = vadd.f32 1.0, %v564_v19  ;;  %577 = vtanh.f32 %v181_v49  ;;  %v115_v26 = vsub.f32 %v33_v13, %v729_v3  ;;  %v37_v49 = vld [vmem:[%s1268_s0 + $0xd0] sm:$0xff] }
  0x16   :  { %v568_v27 = vpop.eup %567  ;;  %475 = vst [vmem:[%s1270_s2 + $0x10] sm:$0xff] %v399_v20  ;;  %v401_v28 = vmul.f32 0.5, %v325_v21  ;;  %v327_v29 = vadd.f32 1.0, %v566_v23  ;;  %579 = vtanh.f32 %v182_v50  ;;  %v116_v30 = vsub.f32 %v34_v18, %v731_v4  ;;  %v41_v23 = vld [vmem:[%s1268_s0 + $0xf0] sm:$0xff] }
  0x17   :  { %v570_v32 = vpop.eup %569  ;;  %476 = vst [vmem:[%s1270_s2 + $0x18] sm:$0xff] %v400_v24  ;;  %v402_v33 = vmul.f32 0.5, %v326_v25  ;;  %v328_v34 = vadd.f32 1.0, %v568_v27  ;;  %581 = vtanh.f32 %v183_v59  ;;  %v191_v35 = vmul.f32 0.5, %v115_v26 }
  0x18   :  { %v572_v37 = vpop.eup %571  ;;  %477 = vst [vmem:[%s1270_s2 + $0x20] sm:$0xff] %v401_v28  ;;  %v403_v38 = vmul.f32 0.5, %v327_v29  ;;  %v329_v39 = vadd.f32 1.0, %v570_v32  ;;  %583 = vtanh.f32 %v184_v60  ;;  %v192_v40 = vmul.f32 0.5, %v116_v30  ;;  %v42_v28 = vld [vmem:[%s1268_s0 + $0xf8] sm:$0xff] }
  0x19   :  { %v574_v41 = vpop.eup %573  ;;  %478 = vst [vmem:[%s1270_s2 + $0x28] sm:$0xff] %v402_v33  ;;  %v404_v42 = vmul.f32 0.5, %v328_v34  ;;  %v330_v43 = vadd.f32 1.0, %v572_v37  ;;  %585 = vtanh.f32 %v185_v61  ;;  %v117_v44 = vsub.f32 %v35_v31, %v729_v3  ;;  %v43_v33 = vld [vmem:[%s1268_s0 + $0x100] sm:$0xff] }
  0x1a   :  { %v576_v45 = vpop.eup %575  ;;  %479 = vst [vmem:[%s1270_s2 + $0x30] sm:$0xff] %v403_v38  ;;  %v405_v46 = vmul.f32 0.5, %v329_v39  ;;  %v331_v47 = vadd.f32 1.0, %v574_v41  ;;  %587 = vtanh.f32 %v186_v1  ;;  %v118_v48 = vsub.f32 %v36_v36, %v731_v4  ;;  %v44_v38 = vld [vmem:[%s1268_s0 + $0x108] sm:$0xff] }
  0x1b   :  { %v578_v50 = vpop.eup %577  ;;  %480 = vst [vmem:[%s1270_s2 + $0x38] sm:$0xff] %v404_v42  ;;  %v406_v51 = vmul.f32 0.5, %v330_v43  ;;  %v332_v52 = vadd.f32 1.0, %v576_v45  ;;  %589 = vtanh.f32 %v813_v2  ;;  %v193_v53 = vmul.f32 0.5, %v117_v44 }
  0x1c   :  { %v580_v55 = vpop.eup %579  ;;  %481 = vst [vmem:[%s1270_s2 + $0x40] sm:$0xff] %v405_v46  ;;  %v407_v56 = vmul.f32 0.5, %v331_v47  ;;  %v333_v57 = vadd.f32 1.0, %v578_v50  ;;  %591 = vtanh.f32 %v815_v7  ;;  %v194_v58 = vmul.f32 0.5, %v118_v48 }
  0x1d   :  { %v582_v59 = vpop.eup %581  ;;  %482 = vst [vmem:[%s1270_s2 + $0x48] sm:$0xff] %v406_v51  ;;  %v408_v60 = vmul.f32 0.5, %v332_v52  ;;  %v334_v61 = vadd.f32 1.0, %v580_v55  ;;  %593 = vtanh.f32 %v822_v17  ;;  %v119_v62 = vsub.f32 %v37_v49, %v729_v3 }
  0x1e   :  { %v584_v63 = vpop.eup %583  ;;  %483 = vst [vmem:[%s1270_s2 + $0x50] sm:$0xff] %v407_v56  ;;  %v409_v0 = vmul.f32 0.5, %v333_v57  ;;  %v335_v1 = vadd.f32 1.0, %v582_v59  ;;  %595 = vtanh.f32 %v190_v22  ;;  %v120_v2 = vsub.f32 %v38_v54, %v731_v4 }
  0x1f   :  { %v586_v6 = vpop.eup %585  ;;  %484 = vst [vmem:[%s1270_s2 + $0x58] sm:$0xff] %v408_v60  ;;  %v410_v7 = vmul.f32 0.5, %v334_v61  ;;  %v336_v8 = vadd.f32 1.0, %v584_v63  ;;  %597 = vtanh.f32 %v191_v35  ;;  %v195_v9 = vmul.f32 0.5, %v119_v62  ;;  %v47_v63 = vld [vmem:[%s1268_s0 + $0x120] sm:$0xff] }
  0x20   :  { %v588_v11 = vpop.eup %587  ;;  %485 = vst [vmem:[%s1270_s2 + $0x60] sm:$0xff] %v409_v0  ;;  %v411_v12 = vmul.f32 0.5, %v335_v1  ;;  %v337_v13 = vadd.f32 1.0, %v586_v6  ;;  %599 = vtanh.f32 %v192_v40  ;;  %v196_v14 = vmul.f32 0.5, %v120_v2  ;;  %v48_v6 = vld [vmem:[%s1268_s0 + $0x128] sm:$0xff] }
  0x21   :  { %v590_v15 = vpop.eup %589  ;;  %486 = vst [vmem:[%s1270_s2 + $0x68] sm:$0xff] %v410_v7  ;;  %v412_v16 = vmul.f32 0.5, %v336_v8  ;;  %v338_v17 = vadd.f32 1.0, %v588_v11  ;;  %601 = vtanh.f32 %v193_v53  ;;  %v121_v18 = vsub.f32 %v39_v5, %v729_v3  ;;  %v45_v53 = vld [vmem:[%s1268_s0 + $0x110] sm:$0xff] }
  0x22   :  { %v592_v19 = vpop.eup %591  ;;  %487 = vst [vmem:[%s1270_s2 + $0x70] sm:$0xff] %v411_v12  ;;  %v413_v20 = vmul.f32 0.5, %v337_v13  ;;  %v339_v21 = vadd.f32 1.0, %v590_v15  ;;  %603 = vtanh.f32 %v194_v58  ;;  %v122_v22 = vsub.f32 %v40_v10, %v731_v4  ;;  %v46_v58 = vld [vmem:[%s1268_s0 + $0x118] sm:$0xff]  ;;  %v49_v7 = vld [vmem:[%s1268_s0 + $0x130] sm:$0xff] }
  0x23   :  { %v594_v24 = vpop.eup %593  ;;  %488 = vst [vmem:[%s1270_s2 + $0x78] sm:$0xff] %v412_v16  ;;  %v414_v25 = vmul.f32 0.5, %v338_v17  ;;  %v340_v26 = vadd.f32 1.0, %v592_v19  ;;  %605 = vtanh.f32 %v195_v9  ;;  %v197_v27 = vmul.f32 0.5, %v121_v18  ;;  %v50_v12 = vld [vmem:[%s1268_s0 + $0x138] sm:$0xff] }
  0x24   :  { %v596_v29 = vpop.eup %595  ;;  %489 = vst [vmem:[%s1270_s2 + $0x80] sm:$0xff] %v413_v20  ;;  %v415_v30 = vmul.f32 0.5, %v339_v21  ;;  %v341_v31 = vadd.f32 1.0, %v594_v24  ;;  %607 = vtanh.f32 %v196_v14  ;;  %v198_v32 = vmul.f32 0.5, %v122_v22  ;;  %v51_v21 = vld [vmem:[%s1268_s0 + $0x140] sm:$0xff] }
  0x25   :  { %v598_v34 = vpop.eup %597  ;;  %490 = vst [vmem:[%s1270_s2 + $0x88] sm:$0xff] %v414_v25  ;;  %v416_v35 = vmul.f32 0.5, %v340_v26  ;;  %v342_v36 = vadd.f32 1.0, %v596_v29  ;;  %609 = vtanh.f32 %v197_v27  ;;  %v123_v37 = vsub.f32 %v41_v23, %v729_v3  ;;  %v52_v26 = vld [vmem:[%s1268_s0 + $0x148] sm:$0xff] }
  0x26   :  { %v600_v39 = vpop.eup %599  ;;  %491 = vst [vmem:[%s1270_s2 + $0x90] sm:$0xff] %v415_v30  ;;  %v417_v40 = vmul.f32 0.5, %v341_v31  ;;  %v343_v41 = vadd.f32 1.0, %v598_v34  ;;  %611 = vtanh.f32 %v198_v32  ;;  %v124_v42 = vsub.f32 %v42_v28, %v731_v4 }
  0x27   :  { %v602_v43 = vpop.eup %601  ;;  %492 = vst [vmem:[%s1270_s2 + $0x98] sm:$0xff] %v416_v35  ;;  %v418_v44 = vmul.f32 0.5, %v342_v36  ;;  %v344_v45 = vadd.f32 1.0, %v600_v39  ;;  %v199_v46 = vmul.f32 0.5, %v123_v37  ;;  %v125_v47 = vsub.f32 %v43_v33, %v729_v3  ;;  %v53_v35 = vld [vmem:[%s1268_s0 + $0x150] sm:$0xff] }
  0x28   :  { %v604_v48 = vpop.eup %603  ;;  %493 = vst [vmem:[%s1270_s2 + $0xa0] sm:$0xff] %v417_v40  ;;  %v419_v49 = vmul.f32 0.5, %v343_v41  ;;  %v345_v50 = vadd.f32 1.0, %v602_v43  ;;  %v200_v51 = vmul.f32 0.5, %v124_v42  ;;  %v126_v52 = vsub.f32 %v44_v38, %v731_v4  ;;  %v54_v40 = vld [vmem:[%s1268_s0 + $0x158] sm:$0xff]  ;;  %v55_v41 = vld [vmem:[%s1268_s0 + $0x160] sm:$0xff] }
  0x29   :  { %v606_v54 = vpop.eup %605  ;;  %494 = vst [vmem:[%s1270_s2 + $0xa8] sm:$0xff] %v418_v44  ;;  %v420_v55 = vmul.f32 0.5, %v344_v45  ;;  %v346_v56 = vadd.f32 1.0, %v604_v48  ;;  %613 = vtanh.f32 %v199_v46  ;;  %v201_v57 = vmul.f32 0.5, %v125_v47  ;;  %v56_v45 = vld [vmem:[%s1268_s0 + $0x168] sm:$0xff] }
  0x2a   :  { %v608_v59 = vpop.eup %607  ;;  %495 = vst [vmem:[%s1270_s2 + $0xb0] sm:$0xff] %v419_v49  ;;  %v421_v60 = vmul.f32 0.5, %v345_v50  ;;  %v347_v61 = vadd.f32 1.0, %v606_v54  ;;  %615 = vtanh.f32 %v200_v51  ;;  %v202_v62 = vmul.f32 0.5, %v126_v52  ;;  %v57_v49 = vld [vmem:[%s1268_s0 + $0x170] sm:$0xff] }
  0x2b   :  { %v610_v0 = vpop.eup %609  ;;  %496 = vst [vmem:[%s1270_s2 + $0xb8] sm:$0xff] %v420_v55  ;;  %v422_v1 = vmul.f32 0.5, %v346_v56  ;;  %v348_v2 = vadd.f32 1.0, %v608_v59  ;;  %617 = vtanh.f32 %v201_v57  ;;  %v127_v5 = vsub.f32 %v45_v53, %v729_v3 }
  0x2c   :  { %v612_v8 = vpop.eup %611  ;;  %497 = vst [vmem:[%s1270_s2 + $0xc0] sm:$0xff] %v421_v60  ;;  %v423_v9 = vmul.f32 0.5, %v347_v61  ;;  %v349_v10 = vadd.f32 1.0, %v610_v0  ;;  %619 = vtanh.f32 %v202_v62  ;;  %v128_v11 = vsub.f32 %v46_v58, %v731_v4 }
  0x2d   :  { %498 = vst [vmem:[%s1270_s2 + $0xc8] sm:$0xff] %v422_v1  ;;  %v424_v13 = vmul.f32 0.5, %v348_v2  ;;  %v350_v14 = vadd.f32 1.0, %v612_v8  ;;  %v203_v15 = vmul.f32 0.5, %v127_v5  ;;  %v129_v16 = vsub.f32 %v47_v63, %v729_v3  ;;  %v58_v63 = vld [vmem:[%s1268_s0 + $0x178] sm:$0xff] }
  0x2e   :  { %499 = vst [vmem:[%s1270_s2 + $0xd0] sm:$0xff] %v423_v9  ;;  %v425_v17 = vmul.f32 0.5, %v349_v10  ;;  %v204_v18 = vmul.f32 0.5, %v128_v11  ;;  %v130_v19 = vsub.f32 %v48_v6, %v731_v4  ;;  %v131_v20 = vsub.f32 %v49_v7, %v729_v3  ;;  %v59_v6 = vld [vmem:[%s1268_s0 + $0x180] sm:$0xff] }
  0x2f   :  { %v614_v22 = vpop.eup %613  ;;  %500 = vst [vmem:[%s1270_s2 + $0xd8] sm:$0xff] %v424_v13  ;;  %v426_v23 = vmul.f32 0.5, %v350_v14  ;;  %621 = vtanh.f32 %v203_v15  ;;  %v205_v24 = vmul.f32 0.5, %v129_v16  ;;  %v132_v25 = vsub.f32 %v50_v12, %v731_v4  ;;  %v60_v15 = vld [vmem:[%s1268_s0 + $0x188] sm:$0xff] }
  0x30   :  { %v616_v27 = vpop.eup %615  ;;  %501 = vst [vmem:[%s1270_s2 + $0xe0] sm:$0xff] %v425_v17  ;;  %v351_v28 = vadd.f32 1.0, %v614_v22  ;;  %623 = vtanh.f32 %v204_v18  ;;  %v206_v29 = vmul.f32 0.5, %v130_v19  ;;  %v207_v30 = vmul.f32 0.5, %v131_v20  ;;  %v61_v20 = vld [vmem:[%s1268_s0 + $0x190] sm:$0xff] }
  0x31   :  { %v618_v31 = vpop.eup %617  ;;  %502 = vst [vmem:[%s1270_s2 + $0xe8] sm:$0xff] %v426_v23  ;;  %v352_v32 = vadd.f32 1.0, %v616_v27  ;;  %625 = vtanh.f32 %v205_v24  ;;  %v208_v33 = vmul.f32 0.5, %v132_v25  ;;  %v133_v34 = vsub.f32 %v51_v21, %v729_v3  ;;  %v62_v21 = vld [vmem:[%s1268_s0 + $0x198] sm:$0xff] }
  0x32   :  { %v620_v36 = vpop.eup %619  ;;  %v427_v37 = vmul.f32 0.5, %v351_v28  ;;  %v353_v38 = vadd.f32 1.0, %v618_v31  ;;  %627 = vtanh.f32 %v206_v29  ;;  %v134_v39 = vsub.f32 %v52_v26, %v731_v4 }
  0x33   :  { %v428_v42 = vmul.f32 0.5, %v352_v32  ;;  %v354_v43 = vadd.f32 1.0, %v620_v36  ;;  %629 = vtanh.f32 %v207_v30  ;;  %v209_v44 = vmul.f32 0.5, %v133_v34  ;;  %v63_v30 = vld [vmem:[%s1268_s0 + $0x1a0] sm:$0xff] }
  0x34   :  { %503 = vst [vmem:[%s1270_s2 + $0xf0] sm:$0xff] %v427_v37  ;;  %v429_v46 = vmul.f32 0.5, %v353_v38  ;;  %631 = vtanh.f32 %v208_v33  ;;  %v210_v47 = vmul.f32 0.5, %v134_v39  ;;  %v135_v48 = vsub.f32 %v53_v35, %v729_v3  ;;  %v64_v35 = vld [vmem:[%s1268_s0 + $0x1a8] sm:$0xff] }
  0x35   :  { %v622_v50 = vpop.eup %621  ;;  %504 = vst [vmem:[%s1270_s2 + $0xf8] sm:$0xff] %v428_v42  ;;  %v430_v51 = vmul.f32 0.5, %v354_v43  ;;  %633 = vtanh.f32 %v209_v44  ;;  %v136_v52 = vsub.f32 %v54_v40, %v731_v4  ;;  %v137_v53 = vsub.f32 %v55_v41, %v729_v3 }
  0x36   :  { %v624_v54 = vpop.eup %623  ;;  %505 = vst [vmem:[%s1270_s2 + $0x100] sm:$0xff] %v429_v46  ;;  %v355_v55 = vadd.f32 1.0, %v622_v50  ;;  %635 = vtanh.f32 %v210_v47  ;;  %v211_v56 = vmul.f32 0.5, %v135_v48  ;;  %v138_v57 = vsub.f32 %v56_v45, %v731_v4  ;;  %v66_v50 = vld [vmem:[%s1268_s0 + $0x1b8] sm:$0xff] }
  0x37   :  { %v626_v58 = vpop.eup %625  ;;  %506 = vst [vmem:[%s1270_s2 + $0x108] sm:$0xff] %v430_v51  ;;  %v356_v59 = vadd.f32 1.0, %v624_v54  ;;  %v212_v60 = vmul.f32 0.5, %v136_v52  ;;  %v213_v61 = vmul.f32 0.5, %v137_v53  ;;  %v139_v62 = vsub.f32 %v57_v49, %v729_v3  ;;  %v65_v49 = vld [vmem:[%s1268_s0 + $0x1b0] sm:$0xff] }
  0x38   :  { %v628_v0 = vpop.eup %627  ;;  %v431_v1 = vmul.f32 0.5, %v355_v55  ;;  %v357_v2 = vadd.f32 1.0, %v626_v58  ;;  %637 = vtanh.f32 %v211_v56  ;;  %v214_v5 = vmul.f32 0.5, %v138_v57  ;;  %v67_v55 = vld [vmem:[%s1268_s0 + $0x1c0] sm:$0xff] }
  0x39   :  { %v630_v7 = vpop.eup %629  ;;  %v432_v8 = vmul.f32 0.5, %v356_v59  ;;  %v358_v9 = vadd.f32 1.0, %v628_v0  ;;  %639 = vtanh.f32 %v212_v60  ;;  %v215_v10 = vmul.f32 0.5, %v139_v62  ;;  %v68_v59 = vld [vmem:[%s1268_s0 + $0x1c8] sm:$0xff]  ;;  %v69_v0 = vld [vmem:[%s1268_s0 + $0x1d0] sm:$0xff] }
  0x3a   :  { %v632_v11 = vpop.eup %631  ;;  %507 = vst [vmem:[%s1270_s2 + $0x110] sm:$0xff] %v431_v1  ;;  %v433_v12 = vmul.f32 0.5, %v357_v2  ;;  %v359_v13 = vadd.f32 1.0, %v630_v7  ;;  %641 = vtanh.f32 %v213_v61  ;;  %v140_v14 = vsub.f32 %v58_v63, %v731_v4  ;;  %v70_v1 = vld [vmem:[%s1268_s0 + $0x1d8] sm:$0xff] }
  0x3b   :  { %v634_v16 = vpop.eup %633  ;;  %508 = vst [vmem:[%s1270_s2 + $0x118] sm:$0xff] %v432_v8  ;;  %v434_v17 = vmul.f32 0.5, %v358_v9  ;;  %v360_v18 = vadd.f32 1.0, %v632_v11  ;;  %643 = vtanh.f32 %v214_v5  ;;  %v141_v19 = vsub.f32 %v59_v6, %v729_v3 }
  0x3c   :  { %v636_v22 = vpop.eup %635  ;;  %509 = vst [vmem:[%s1270_s2 + $0x120] sm:$0xff] %v433_v12  ;;  %v435_v23 = vmul.f32 0.5, %v359_v13  ;;  %v361_v24 = vadd.f32 1.0, %v634_v16  ;;  %645 = vtanh.f32 %v215_v10  ;;  %v216_v25 = vmul.f32 0.5, %v140_v14 }
  0x3d   :  { %510 = vst [vmem:[%s1270_s2 + $0x128] sm:$0xff] %v434_v17  ;;  %v436_v26 = vmul.f32 0.5, %v360_v18  ;;  %v362_v27 = vadd.f32 1.0, %v636_v22  ;;  %v217_v28 = vmul.f32 0.5, %v141_v19  ;;  %v142_v29 = vsub.f32 %v60_v15, %v731_v4  ;;  %v71_v17 = vld [vmem:[%s1268_s0 + $0x1e0] sm:$0xff]  ;;  %v72_v22 = vld [vmem:[%s1268_s0 + $0x1e8] sm:$0xff] }
  0x3e   :  { %v638_v31 = vpop.eup %637  ;;  %511 = vst [vmem:[%s1270_s2 + $0x130] sm:$0xff] %v435_v23  ;;  %v437_v32 = vmul.f32 0.5, %v361_v24  ;;  %647 = vtanh.f32 %v216_v25  ;;  %v143_v33 = vsub.f32 %v61_v20, %v729_v3  ;;  %v144_v34 = vsub.f32 %v62_v21, %v731_v4 }
  0x3f   :  { %v640_v36 = vpop.eup %639  ;;  %512 = vst [vmem:[%s1270_s2 + $0x138] sm:$0xff] %v436_v26  ;;  %v438_v37 = vmul.f32 0.5, %v362_v27  ;;  %v363_v38 = vadd.f32 1.0, %v638_v31  ;;  %649 = vtanh.f32 %v217_v28  ;;  %v218_v39 = vmul.f32 0.5, %v142_v29  ;;  %v73_v31 = vld [vmem:[%s1268_s0 + $0x1f0] sm:$0xff] }
  0x40   :  { %v642_v40 = vpop.eup %641  ;;  %513 = vst [vmem:[%s1270_s2 + $0x140] sm:$0xff] %v437_v32  ;;  %v364_v41 = vadd.f32 1.0, %v640_v36  ;;  %v219_v42 = vmul.f32 0.5, %v143_v33  ;;  %v220_v43 = vmul.f32 0.5, %v144_v34  ;;  %v145_v44 = vsub.f32 %v63_v30, %v729_v3  ;;  %v74_v36 = vld [vmem:[%s1268_s0 + $0x1f8] sm:$0xff] }
  0x41   :  { %v644_v45 = vpop.eup %643  ;;  %514 = vst [vmem:[%s1270_s2 + $0x148] sm:$0xff] %v438_v37  ;;  %v439_v46 = vmul.f32 0.5, %v363_v38  ;;  %v365_v47 = vadd.f32 1.0, %v642_v40  ;;  %651 = vtanh.f32 %v218_v39  ;;  %v146_v48 = vsub.f32 %v64_v35, %v731_v4  ;;  %v75_v37 = vld [vmem:[%s1268_s0 + $0x200] sm:$0xff] }
  0x42   :  { %v646_v51 = vpop.eup %645  ;;  %v440_v52 = vmul.f32 0.5, %v364_v41  ;;  %v366_v53 = vadd.f32 1.0, %v644_v45  ;;  %653 = vtanh.f32 %v219_v42  ;;  %v221_v54 = vmul.f32 0.5, %v145_v44  ;;  %v76_v41 = vld [vmem:[%s1268_s0 + $0x208] sm:$0xff]  ;;  %v77_v45 = vld [vmem:[%s1268_s0 + $0x210] sm:$0xff] }
  0x43   :  { %515 = vst [vmem:[%s1270_s2 + $0x150] sm:$0xff] %v439_v46  ;;  %v441_v56 = vmul.f32 0.5, %v365_v47  ;;  %v367_v57 = vadd.f32 1.0, %v646_v51  ;;  %655 = vtanh.f32 %v220_v43  ;;  %v222_v58 = vmul.f32 0.5, %v146_v48 }
  0x44   :  { %v648_v60 = vpop.eup %647  ;;  %516 = vst [vmem:[%s1270_s2 + $0x158] sm:$0xff] %v440_v52  ;;  %v442_v61 = vmul.f32 0.5, %v366_v53  ;;  %657 = vtanh.f32 %v221_v54  ;;  %v147_v62 = vsub.f32 %v65_v49, %v729_v3  ;;  %v148_v63 = vsub.f32 %v66_v50, %v731_v4 }
  0x45   :  { %v650_v2 = vpop.eup %649  ;;  %517 = vst [vmem:[%s1270_s2 + $0x160] sm:$0xff] %v441_v56  ;;  %v443_v5 = vmul.f32 0.5, %v367_v57  ;;  %v368_v6 = vadd.f32 1.0, %v648_v60  ;;  %659 = vtanh.f32 %v222_v58  ;;  %v149_v7 = vsub.f32 %v67_v55, %v729_v3 }
  0x46   :  { %518 = vst [vmem:[%s1270_s2 + $0x168] sm:$0xff] %v442_v61  ;;  %v369_v8 = vadd.f32 1.0, %v650_v2  ;;  %v223_v9 = vmul.f32 0.5, %v147_v62  ;;  %v224_v10 = vmul.f32 0.5, %v148_v63  ;;  %v150_v11 = vsub.f32 %v68_v59, %v731_v4  ;;  %v78_v59 = vld [vmem:[%s1268_s0 + $0x218] sm:$0xff] }
  0x47   :  { %v652_v12 = vpop.eup %651  ;;  %519 = vst [vmem:[%s1270_s2 + $0x170] sm:$0xff] %v443_v5  ;;  %v444_v13 = vmul.f32 0.5, %v368_v6  ;;  %v225_v14 = vmul.f32 0.5, %v149_v7  ;;  %v151_v15 = vsub.f32 %v69_v0, %v729_v3  ;;  %v152_v16 = vsub.f32 %v70_v1, %v731_v4  ;;  %v79_v0 = vld [vmem:[%s1268_s0 + $0x220] sm:$0xff] }
  0x48   :  { %v654_v18 = vpop.eup %653  ;;  %v445_v19 = vmul.f32 0.5, %v369_v8  ;;  %v370_v20 = vadd.f32 1.0, %v652_v12  ;;  %661 = vtanh.f32 %v223_v9  ;;  %v226_v21 = vmul.f32 0.5, %v150_v11  ;;  %v80_v11 = vld [vmem:[%s1268_s0 + $0x228] sm:$0xff] }
  0x49   :  { %v656_v23 = vpop.eup %655  ;;  %520 = vst [vmem:[%s1270_s2 + $0x178] sm:$0xff] %v444_v13  ;;  %v371_v24 = vadd.f32 1.0, %v654_v18  ;;  %663 = vtanh.f32 %v224_v10  ;;  %v227_v25 = vmul.f32 0.5, %v151_v15  ;;  %v228_v26 = vmul.f32 0.5, %v152_v16  ;;  %v81_v16 = vld [vmem:[%s1268_s0 + $0x230] sm:$0xff] }
  0x4a   :  { %v658_v27 = vpop.eup %657  ;;  %521 = vst [vmem:[%s1270_s2 + $0x180] sm:$0xff] %v445_v19  ;;  %v446_v28 = vmul.f32 0.5, %v370_v20  ;;  %v372_v29 = vadd.f32 1.0, %v656_v23  ;;  %665 = vtanh.f32 %v225_v14  ;;  %v153_v30 = vsub.f32 %v71_v17, %v729_v3  ;;  %v82_v17 = vld [vmem:[%s1268_s0 + $0x238] sm:$0xff] }
  0x4b   :  { %v660_v32 = vpop.eup %659  ;;  %v447_v33 = vmul.f32 0.5, %v371_v24  ;;  %v373_v34 = vadd.f32 1.0, %v658_v27  ;;  %667 = vtanh.f32 %v226_v21  ;;  %v154_v35 = vsub.f32 %v72_v22, %v731_v4 }
  0x4c   :  { %522 = vst [vmem:[%s1270_s2 + $0x188] sm:$0xff] %v446_v28  ;;  %v448_v38 = vmul.f32 0.5, %v372_v29  ;;  %v374_v39 = vadd.f32 1.0, %v660_v32  ;;  %669 = vtanh.f32 %v227_v25  ;;  %v229_v40 = vmul.f32 0.5, %v153_v30 }
  0x4d   :  { %523 = vst [vmem:[%s1270_s2 + $0x190] sm:$0xff] %v447_v33  ;;  %v449_v42 = vmul.f32 0.5, %v373_v34  ;;  %671 = vtanh.f32 %v228_v26  ;;  %v230_v43 = vmul.f32 0.5, %v154_v35  ;;  %v155_v44 = vsub.f32 %v73_v31, %v729_v3  ;;  %v83_v26 = vld [vmem:[%s1268_s0 + $0x240] sm:$0xff]  ;;  %v84_v31 = vld [vmem:[%s1268_s0 + $0x248] sm:$0xff] }
  0x4e   :  { %v662_v46 = vpop.eup %661  ;;  %524 = vst [vmem:[%s1270_s2 + $0x198] sm:$0xff] %v448_v38  ;;  %v450_v47 = vmul.f32 0.5, %v374_v39  ;;  %673 = vtanh.f32 %v229_v40  ;;  %v156_v48 = vsub.f32 %v74_v36, %v731_v4  ;;  %v157_v49 = vsub.f32 %v75_v37, %v729_v3 }
  0x4f   :  { %v664_v50 = vpop.eup %663  ;;  %525 = vst [vmem:[%s1270_s2 + $0x1a0] sm:$0xff] %v449_v42  ;;  %v375_v51 = vadd.f32 1.0, %v662_v46  ;;  %675 = vtanh.f32 %v230_v43  ;;  %v231_v52 = vmul.f32 0.5, %v155_v44  ;;  %v158_v53 = vsub.f32 %v76_v41, %v731_v4  ;;  %v86_v46 = vld [vmem:[%s1268_s0 + $0x258] sm:$0xff] }
  0x50   :  { %v666_v54 = vpop.eup %665  ;;  %526 = vst [vmem:[%s1270_s2 + $0x1a8] sm:$0xff] %v450_v47  ;;  %v376_v55 = vadd.f32 1.0, %v664_v50  ;;  %v232_v56 = vmul.f32 0.5, %v156_v48  ;;  %v233_v57 = vmul.f32 0.5, %v157_v49  ;;  %v159_v58 = vsub.f32 %v77_v45, %v729_v3  ;;  %v85_v45 = vld [vmem:[%s1268_s0 + $0x250] sm:$0xff] }
  0x51   :  { %v668_v60 = vpop.eup %667  ;;  %v451_v61 = vmul.f32 0.5, %v375_v51  ;;  %v377_v62 = vadd.f32 1.0, %v666_v54  ;;  %677 = vtanh.f32 %v231_v52  ;;  %v234_v63 = vmul.f32 0.5, %v158_v53 }
  0x52   :  { %v670_v1 = vpop.eup %669  ;;  %v452_v2 = vmul.f32 0.5, %v376_v55  ;;  %v378_v5 = vadd.f32 1.0, %v668_v60  ;;  %679 = vtanh.f32 %v232_v56  ;;  %v235_v6 = vmul.f32 0.5, %v159_v58 }
  0x53   :  { %v672_v7 = vpop.eup %671  ;;  %527 = vst [vmem:[%s1270_s2 + $0x1b0] sm:$0xff] %v451_v61  ;;  %v453_v8 = vmul.f32 0.5, %v377_v62  ;;  %v379_v9 = vadd.f32 1.0, %v670_v1  ;;  %681 = vtanh.f32 %v233_v57  ;;  %v160_v10 = vsub.f32 %v78_v59, %v731_v4 }
  0x54   :  { %v674_v12 = vpop.eup %673  ;;  %528 = vst [vmem:[%s1270_s2 + $0x1b8] sm:$0xff] %v452_v2  ;;  %v454_v13 = vmul.f32 0.5, %v378_v5  ;;  %v380_v14 = vadd.f32 1.0, %v672_v7  ;;  %683 = vtanh.f32 %v234_v63  ;;  %v161_v15 = vsub.f32 %v79_v0, %v729_v3 }
  0x55   :  { %v676_v18 = vpop.eup %675  ;;  %529 = vst [vmem:[%s1270_s2 + $0x1c0] sm:$0xff] %v453_v8  ;;  %v455_v19 = vmul.f32 0.5, %v379_v9  ;;  %v381_v20 = vadd.f32 1.0, %v674_v12  ;;  %685 = vtanh.f32 %v235_v6  ;;  %v236_v21 = vmul.f32 0.5, %v160_v10 }
  0x56   :  { %530 = vst [vmem:[%s1270_s2 + $0x1c8] sm:$0xff] %v454_v13  ;;  %v456_v22 = vmul.f32 0.5, %v380_v14  ;;  %v382_v23 = vadd.f32 1.0, %v676_v18  ;;  %v237_v24 = vmul.f32 0.5, %v161_v15  ;;  %v162_v25 = vsub.f32 %v80_v11, %v731_v4 }
  0x57   :  { %v678_v27 = vpop.eup %677  ;;  %531 = vst [vmem:[%s1270_s2 + $0x1d0] sm:$0xff] %v455_v19  ;;  %v457_v28 = vmul.f32 0.5, %v381_v20  ;;  %687 = vtanh.f32 %v236_v21  ;;  %v163_v29 = vsub.f32 %v81_v16, %v729_v3  ;;  %v164_v30 = vsub.f32 %v82_v17, %v731_v4 }
  0x58   :  { %v680_v32 = vpop.eup %679  ;;  %532 = vst [vmem:[%s1270_s2 + $0x1d8] sm:$0xff] %v456_v22  ;;  %v458_v33 = vmul.f32 0.5, %v382_v23  ;;  %v383_v34 = vadd.f32 1.0, %v678_v27  ;;  %689 = vtanh.f32 %v237_v24  ;;  %v238_v35 = vmul.f32 0.5, %v162_v25 }
  0x59   :  { %v682_v36 = vpop.eup %681  ;;  %533 = vst [vmem:[%s1270_s2 + $0x1e0] sm:$0xff] %v457_v28  ;;  %v384_v37 = vadd.f32 1.0, %v680_v32  ;;  %v239_v38 = vmul.f32 0.5, %v163_v29  ;;  %v240_v39 = vmul.f32 0.5, %v164_v30  ;;  %v165_v40 = vsub.f32 %v83_v26, %v729_v3 }
  0x5a   :  { %v684_v41 = vpop.eup %683  ;;  %534 = vst [vmem:[%s1270_s2 + $0x1e8] sm:$0xff] %v458_v33  ;;  %v459_v42 = vmul.f32 0.5, %v383_v34  ;;  %v385_v43 = vadd.f32 1.0, %v682_v36  ;;  %691 = vtanh.f32 %v238_v35  ;;  %v166_v44 = vsub.f32 %v84_v31, %v731_v4 }
  0x5b   :  { %v686_v47 = vpop.eup %685  ;;  %v460_v48 = vmul.f32 0.5, %v384_v37  ;;  %v386_v49 = vadd.f32 1.0, %v684_v41  ;;  %693 = vtanh.f32 %v239_v38  ;;  %v241_v50 = vmul.f32 0.5, %v165_v40 }
  0x5c   :  { %535 = vst [vmem:[%s1270_s2 + $0x1f0] sm:$0xff] %v459_v42  ;;  %v461_v51 = vmul.f32 0.5, %v385_v43  ;;  %v387_v52 = vadd.f32 1.0, %v686_v47  ;;  %695 = vtanh.f32 %v240_v39  ;;  %v242_v53 = vmul.f32 0.5, %v166_v44 }
  0x5d   :  { %v688_v54 = vpop.eup %687  ;;  %536 = vst [vmem:[%s1270_s2 + $0x1f8] sm:$0xff] %v460_v48  ;;  %v462_v55 = vmul.f32 0.5, %v386_v49  ;;  %697 = vtanh.f32 %v241_v50  ;;  %v167_v56 = vsub.f32 %v85_v45, %v729_v3  ;;  %v168_v57 = vsub.f32 %v86_v46, %v731_v4 }
  0x5e   :  { %v690_v58 = vpop.eup %689  ;;  %537 = vst [vmem:[%s1270_s2 + $0x200] sm:$0xff] %v461_v51  ;;  %v463_v59 = vmul.f32 0.5, %v387_v52  ;;  %v388_v60 = vadd.f32 1.0, %v688_v54  ;;  %699 = vtanh.f32 %v242_v53 }
  0x5f   :  { %538 = vst [vmem:[%s1270_s2 + $0x208] sm:$0xff] %v462_v55  ;;  %v389_v61 = vadd.f32 1.0, %v690_v58  ;;  %v243_v62 = vmul.f32 0.5, %v167_v56  ;;  %v244_v63 = vmul.f32 0.5, %v168_v57 }
  0x60   :  { %v692_v0 = vpop.eup %691  ;;  %539 = vst [vmem:[%s1270_s2 + $0x210] sm:$0xff] %v463_v59  ;;  %v464_v3 = vmul.f32 0.5, %v388_v60 }
  0x61   :  { %v694_v4 = vpop.eup %693  ;;  %v465_v1 = vmul.f32 0.5, %v389_v61  ;;  %v390_v2 = vadd.f32 1.0, %v692_v0  ;;  %701 = vtanh.f32 %v243_v62 }
  0x62   :  { %v696_v5 = vpop.eup %695  ;;  %540 = vst [vmem:[%s1270_s2 + $0x218] sm:$0xff] %v464_v3  ;;  %v391_v6 = vadd.f32 1.0, %v694_v4  ;;  %703 = vtanh.f32 %v244_v63 }
  0x63   :  { %v698_v7 = vpop.eup %697  ;;  %541 = vst [vmem:[%s1270_s2 + $0x220] sm:$0xff] %v465_v1  ;;  %v466_v8 = vmul.f32 0.5, %v390_v2  ;;  %v392_v9 = vadd.f32 1.0, %v696_v5 }
  0x64   :  { %v700_v10 = vpop.eup %699  ;;  %v467_v11 = vmul.f32 0.5, %v391_v6  ;;  %v393_v12 = vadd.f32 1.0, %v698_v7 }
  0x65   :  { %542 = vst [vmem:[%s1270_s2 + $0x228] sm:$0xff] %v466_v8  ;;  %v468_v13 = vmul.f32 0.5, %v392_v9  ;;  %v394_v14 = vadd.f32 1.0, %v700_v10 }
  0x66   :  { %543 = vst [vmem:[%s1270_s2 + $0x230] sm:$0xff] %v467_v11  ;;  %v469_v15 = vmul.f32 0.5, %v393_v12 }
  0x67   :  { %v702_v16 = vpop.eup %701  ;;  %544 = vst [vmem:[%s1270_s2 + $0x238] sm:$0xff] %v468_v13  ;;  %v470_v17 = vmul.f32 0.5, %v394_v14 }
  0x68   :  { %v704_v18 = vpop.eup %703  ;;  %545 = vst [vmem:[%s1270_s2 + $0x240] sm:$0xff] %v469_v15  ;;  %v395_v19 = vadd.f32 1.0, %v702_v16 }
  0x69   :  { %546 = vst [vmem:[%s1270_s2 + $0x248] sm:$0xff] %v470_v17  ;;  %v396_v20 = vadd.f32 1.0, %v704_v18 }
  0x6a   :  { %v471_v21 = vmul.f32 0.5, %v395_v19 }
  0x6b   :  { %v472_v22 = vmul.f32 0.5, %v396_v20 }
  0x6c   :  { %547 = vst [vmem:[%s1270_s2 + $0x250] sm:$0xff] %v471_v21 }
  0x6d   :  { %548 = vst [vmem:[%s1270_s2 + $0x258] sm:$0xff] %v472_v22 }

</bundles_post_ra>
